<compile_context>
chip_gen: v6e
topology: v6e:2x2x1
jax: 0.10.0
libtpu: 0.0.40
codegen_flags: <defaults>
</compile_context>

<pallas_src>
import jax
import jax.numpy as jnp
from jax.experimental import pallas as pl
from jax.experimental.pallas import tpu as pltpu

HIDDEN = 200          # logical width fixed by the module (fc1/fc2, bn1/bn2)
HIDDEN_PAD = 256      # lane-dense padded width (2 x 128 lanes, fills v6e/v7x MXU)
OUT_PAD = 128         # lane-dense padded output width
BN_EPS = 1e-5

_VMEM = pl.BlockSpec(memory_space=pltpu.MemorySpace.VMEM)


# ----------------------------------------------------------------------------- kernel
def _mlp_body(xs, w1_ref, w2_ref, w4_ref, vecs_ref, o_ref):
    """fc1 -> bn1 -> relu(fc2) -> bn2 -> fc4 on xs: [M, D] -> o_ref: [M, OUT_PAD].

    vecs_ref packs the per-channel vectors, one per row (all padded with zeros):
      row 0: b1, 1: g1, 2: be1, 3: b2, 4: g2, 5: be2, 6: b4 (first OUT_PAD lanes).
    """
    M = xs.shape[0]
    inv_m = 1.0 / M                                   # static python float
    ones_row = jnp.ones((1, M), jnp.float32)          # for MXU-side axis-0 sums

    b1 = vecs_ref[0:1, :]
    g1 = vecs_ref[1:2, :]
    be1 = vecs_ref[2:3, :]
    b2 = vecs_ref[3:4, :]
    g2 = vecs_ref[4:5, :]
    be2 = vecs_ref[5:6, :]
    b4 = vecs_ref[6:7, :OUT_PAD]

    def bn(h, g, be):
        # two-pass batch statistics (biased variance), reductions via MXU matmul
        mu = jnp.dot(ones_row, h, preferred_element_type=jnp.float32) * inv_m
        c = h - mu
        var = jnp.dot(ones_row, c * c, preferred_element_type=jnp.float32) * inv_m
        scale = g * jax.lax.rsqrt(var + BN_EPS)
        return c * scale + be                          # single fused scale/shift

    # fc1 -> bn1
    h1 = jnp.dot(xs, w1_ref[...], preferred_element_type=jnp.float32) + b1
    h1 = bn(h1, g1, be1)
    # relu(fc2) -> bn2
    h2 = jnp.dot(h1, w2_ref[...], preferred_element_type=jnp.float32) + b2
    h2 = jnp.maximum(h2, 0.0)
    h2 = bn(h2, g2, be2)
    # fc4 (lane-dense padded output)
    o_ref[...] = jnp.dot(h2, w4_ref[...], preferred_element_type=jnp.float32) + b4


def pe_kernel(x_ref, w1s_ref, w2_ref, w4_ref, vecs_ref, o_ref):
    """Point-estimate path: S already folded into w1s (wrapper side)."""
    _mlp_body(x_ref[...], w1s_ref, w2_ref, w4_ref, vecs_ref, o_ref)


def sampled_kernel(x_ref, s_ref, w1_ref, w2_ref, w4_ref, vecs_ref, o_ref):
    """Sampled path: einsum('ij,mj->imj', SstackT, x).reshape(K*B, D) done in-kernel."""
    x = x_ref[...]                                     # [B, D]
    s = s_ref[...]                                     # [K, D]
    B = x.shape[0]
    K, D = s.shape
    xs = (s[:, None, :] * x[None, :, :]).reshape(K * B, D)
    _mlp_body(xs, w1_ref, w2_ref, w4_ref, vecs_ref, o_ref)


# ----------------------------------------------------------------------------- wrappers
def _call_pe(x, w1_scaled, kp):
    B = x.shape[0]
    args = (x, w1_scaled, kp["w2"], kp["w4"], kp["vecs"])
    return pl.pallas_call(
        pe_kernel,
        out_shape=jax.ShapeDtypeStruct((B, OUT_PAD), jnp.float32),
        in_specs=[_VMEM] * len(args),
        out_specs=_VMEM,
    )(*args)


def _call_sampled(x, s, kp):
    M = s.shape[0] * x.shape[0]
    args = (x, s, kp["w1"], kp["w2"], kp["w4"], kp["vecs"])
    return pl.pallas_call(
        sampled_kernel,
        out_shape=jax.ShapeDtypeStruct((M, OUT_PAD), jnp.float32),
        in_specs=[_VMEM] * len(args),
        out_specs=_VMEM,
    )(*args)


# ----------------------------------------------------------------------------- params
def init_params(key, input_num, output_num):
    """Raw (unpadded) parameters, mirroring the PyTorch module."""
    ks = jax.random.split(key, 6)
    return {
        "switch": -1e-10 * jnp.ones((input_num,), jnp.float32),   # Parameter(-1e-10*ones)
        "w1": 0.1 * jax.random.normal(ks[0], (input_num, HIDDEN), jnp.float32),
        "b1": 0.01 * jax.random.normal(ks[1], (1, HIDDEN), jnp.float32),
        "w2": 0.1 * jax.random.normal(ks[2], (HIDDEN, HIDDEN), jnp.float32),
        "b2": 0.01 * jax.random.normal(ks[3], (1, HIDDEN), jnp.float32),
        "w4": 0.1 * jax.random.normal(ks[4], (HIDDEN, output_num), jnp.float32),
        "b4": 0.01 * jax.random.normal(ks[5], (1, output_num), jnp.float32),
        # BatchNorm1d affine params (PyTorch default init: weight=1, bias=0)
        "g1": jnp.ones((1, HIDDEN), jnp.float32),
        "be1": jnp.zeros((1, HIDDEN), jnp.float32),
        "g2": jnp.ones((1, HIDDEN), jnp.float32),
        "be2": jnp.zeros((1, HIDDEN), jnp.float32),
    }


def pack_params(p):
    """Zero-pad to lane-dense shapes and pack per-channel vectors into one [8, 256] slab.

    Zero padding keeps padded channels inert through BN (mu=var=0, g=be=0 -> output 0)
    and through the matmuls (zero weight rows/cols contribute nothing).
    """
    D = p["w1"].shape[0]
    d_out = p["w4"].shape[1]
    assert d_out <= OUT_PAD
    w1p = jnp.zeros((D, HIDDEN_PAD), jnp.float32).at[:, :HIDDEN].set(p["w1"])
    w2p = jnp.zeros((HIDDEN_PAD, HIDDEN_PAD), jnp.float32).at[:HIDDEN, :HIDDEN].set(p["w2"])
    w4p = jnp.zeros((HIDDEN_PAD, OUT_PAD), jnp.float32).at[:HIDDEN, :d_out].set(p["w4"])
    vecs = jnp.zeros((8, HIDDEN_PAD), jnp.float32)
    vecs = vecs.at[0, :HIDDEN].set(p["b1"][0])
    vecs = vecs.at[1, :HIDDEN].set(p["g1"][0])
    vecs = vecs.at[2, :HIDDEN].set(p["be1"][0])
    vecs = vecs.at[3, :HIDDEN].set(p["b2"][0])
    vecs = vecs.at[4, :HIDDEN].set(p["g2"][0])
    vecs = vecs.at[5, :HIDDEN].set(p["be2"][0])
    vecs = vecs.at[6, :d_out].set(p["b4"][0])
    return {"w1": w1p, "w2": w2p, "w4": w4p, "vecs": vecs, "d_out": d_out}


# ----------------------------------------------------------------------------- forward
def modelnn_forward(x, params, kparams, *, point_estimate, num_samps_for_switch,
                    gamma_key=None):
    """Mirrors Modelnn.forward. Returns (output, phi, S, pre_phi, var_phi)."""
    pre_phi = params["switch"]
    phi = jax.nn.softplus(pre_phi)
    # TODO(synk): the `any(torch.isnan(phi))` / zero-sum `print` guards are host-side
    # debugging with no kernel-compute equivalent; omitted.
    sphi = jnp.sum(phi)
    var_phi = phi / sphi * (1 - phi / sphi) / (sphi + 1)
    d_out = kparams["d_out"]

    if point_estimate:
        S = phi / sphi                                         # [D]
        # fold the switch into fc1's weight: (x*S) @ w1 == x @ (S[:,None]*w1)
        w1_scaled = S[:, None] * kparams["w1"]
        out = _call_pe(x, w1_scaled, kparams)[:, :d_out]       # [B, d_out]
        return out, phi, S, pre_phi, var_phi
    else:
        # Gamma(phi, 1) rsample is stochastic glue done in plain JAX.
        conc = jnp.tile(phi[:, None], (1, num_samps_for_switch))    # [D, K]
        gamma_samps = jax.random.gamma(gamma_key, conc)              # beta = 1
        Sstack = gamma_samps / jnp.sum(gamma_samps, axis=0)          # [D, K]
        SstackT = Sstack.T                                           # [K, D]
        out = _call_sampled(x, SstackT, kparams)[:, :d_out]          # [K*B, d_out]
        out = out.reshape(num_samps_for_switch, x.shape[0], d_out)
        out = jnp.transpose(out, (1, 0, 2))                          # [B, K, d_out]
        return out, phi, SstackT, pre_phi, var_phi


# ----------------------------------------------------------------------------- reference
def _ref_mlp(xs, params):
    """Pure-JAX reference using the raw (unpadded) params and original op order."""
    def bn(h, g, b):
        mu = jnp.mean(h, axis=0, keepdims=True)
        var = jnp.mean((h - mu) ** 2, axis=0, keepdims=True)
        return (h - mu) / jnp.sqrt(var + BN_EPS) * g + b

    h1 = bn(xs @ params["w1"] + params["b1"], params["g1"], params["be1"])
    h2 = bn(jnp.maximum(h1 @ params["w2"] + params["b2"], 0.0),
            params["g2"], params["be2"])
    return h2 @ params["w4"] + params["b4"]


# ----------------------------------------------------------------------------- main
if __name__ == "__main__":
    key = jax.random.PRNGKey(0)
    k_param, k_x, k_gamma = jax.random.split(key, 3)

    input_num = 32
    output_num = 16
    mini_batch_size = 8
    num_samps_for_switch = 4

    params = init_params(k_param, input_num, output_num)
    kparams = pack_params(params)
    x = jax.random.normal(k_x, (mini_batch_size, input_num), jnp.float32)

    # ---- point_estimate = True path ----
    out_pe, phi, S_pe, pre_phi, var_phi = modelnn_forward(
        x, params, kparams, point_estimate=True,
        num_samps_for_switch=num_samps_for_switch)
    out_pe = jax.block_until_ready(out_pe)
    ref_pe = _ref_mlp(x * S_pe[None, :], params)
    assert out_pe.shape == (mini_batch_size, output_num)
    assert jnp.allclose(out_pe, ref_pe, rtol=1e-4, atol=1e-4)

    # ---- point_estimate = False path ----
    out_s, phi2, SstackT, _, _ = modelnn_forward(
        x, params, kparams, point_estimate=False,
        num_samps_for_switch=num_samps_for_switch, gamma_key=k_gamma)
    out_s = jax.block_until_ready(out_s)
    xs_ref = (SstackT[:, None, :] * x[None, :, :]).reshape(-1, input_num)
    ref_s = _ref_mlp(xs_ref, params).reshape(num_samps_for_switch, mini_batch_size, -1)
    ref_s = jnp.transpose(ref_s, (1, 0, 2))
    assert out_s.shape == (mini_batch_size, num_samps_for_switch, output_num)
    assert jnp.allclose(out_s, ref_s, rtol=1e-4, atol=1e-4)

    print("KERNEL_OK")
</pallas_src>

<mosaic_0001>
module attributes {stable_mosaic.version = 11 : i64} {
  func.func @pe_kernel(%arg0: memref<8x32xf32, #tpu.memory_space<vmem>>, %arg1: memref<32x256xf32, #tpu.memory_space<vmem>>, %arg2: memref<256x256xf32, #tpu.memory_space<vmem>>, %arg3: memref<256x128xf32, #tpu.memory_space<vmem>>, %arg4: memref<8x256xf32, #tpu.memory_space<vmem>>, %arg5: memref<8x128xf32, #tpu.memory_space<vmem>>) attributes {dimension_semantics = [], scalar_prefetch = 0 : i64, scratch_operands = 0 : i64, tpu.core_type = #tpu.core_type<tc>} {
    %c0 = arith.constant 0 : index
    %c0_0 = arith.constant 0 : index
    %0 = vector.load %arg0[%c0, %c0_0] : memref<8x32xf32, #tpu.memory_space<vmem>>, vector<8x32xf32>
    %cst = arith.constant 1.000000e+00 : f32
    %1 = vector.broadcast %cst : f32 to vector<1x8xf32>
    %c0_1 = arith.constant 0 : index
    %c0_2 = arith.constant 0 : index
    %2 = vector.load %arg4[%c0_1, %c0_2] : memref<8x256xf32, #tpu.memory_space<vmem>>, vector<1x256xf32>
    %c1 = arith.constant 1 : index
    %c0_3 = arith.constant 0 : index
    %3 = vector.load %arg4[%c1, %c0_3] : memref<8x256xf32, #tpu.memory_space<vmem>>, vector<1x256xf32>
    %c2 = arith.constant 2 : index
    %c0_4 = arith.constant 0 : index
    %4 = vector.load %arg4[%c2, %c0_4] : memref<8x256xf32, #tpu.memory_space<vmem>>, vector<1x256xf32>
    %c3 = arith.constant 3 : index
    %c0_5 = arith.constant 0 : index
    %5 = vector.load %arg4[%c3, %c0_5] : memref<8x256xf32, #tpu.memory_space<vmem>>, vector<1x256xf32>
    %c4 = arith.constant 4 : index
    %c0_6 = arith.constant 0 : index
    %6 = vector.load %arg4[%c4, %c0_6] : memref<8x256xf32, #tpu.memory_space<vmem>>, vector<1x256xf32>
    %c5 = arith.constant 5 : index
    %c0_7 = arith.constant 0 : index
    %7 = vector.load %arg4[%c5, %c0_7] : memref<8x256xf32, #tpu.memory_space<vmem>>, vector<1x256xf32>
    %c6 = arith.constant 6 : index
    %c0_8 = arith.constant 0 : index
    %8 = vector.load %arg4[%c6, %c0_8] : memref<8x256xf32, #tpu.memory_space<vmem>>, vector<1x128xf32>
    %c0_9 = arith.constant 0 : index
    %c0_10 = arith.constant 0 : index
    %9 = vector.load %arg1[%c0_9, %c0_10] : memref<32x256xf32, #tpu.memory_space<vmem>>, vector<32x256xf32>
    %cst_11 = arith.constant dense<0.000000e+00> : vector<8x256xf32>
    %10 = tpu.matmul %0, %9, %cst_11 {dimension_numbers = #tpu.dot_dimension_numbers<[1], [0], [0], [1], [0, 0, 1, 1], [], []>} : vector<8x32xf32>, vector<32x256xf32>, vector<8x256xf32> -> vector<8x256xf32>
    %11 = vector.broadcast %2 : vector<1x256xf32> to vector<8x256xf32>
    %12 = arith.addf %10, %11 : vector<8x256xf32>
    %cst_12 = arith.constant dense<0.000000e+00> : vector<1x256xf32>
    %13 = tpu.matmul %1, %12, %cst_12 {dimension_numbers = #tpu.dot_dimension_numbers<[1], [0], [0], [1], [0, 0, 1, 1], [], []>} : vector<1x8xf32>, vector<8x256xf32>, vector<1x256xf32> -> vector<1x256xf32>
    %cst_13 = arith.constant 1.250000e-01 : f32
    %14 = vector.broadcast %cst_13 : f32 to vector<1x256xf32>
    %15 = arith.mulf %13, %14 : vector<1x256xf32>
    %16 = vector.broadcast %15 : vector<1x256xf32> to vector<8x256xf32>
    %17 = arith.subf %12, %16 : vector<8x256xf32>
    %18 = arith.mulf %17, %17 : vector<8x256xf32>
    %cst_14 = arith.constant dense<0.000000e+00> : vector<1x256xf32>
    %19 = tpu.matmul %1, %18, %cst_14 {dimension_numbers = #tpu.dot_dimension_numbers<[1], [0], [0], [1], [0, 0, 1, 1], [], []>} : vector<1x8xf32>, vector<8x256xf32>, vector<1x256xf32> -> vector<1x256xf32>
    %cst_15 = arith.constant 1.250000e-01 : f32
    %20 = vector.broadcast %cst_15 : f32 to vector<1x256xf32>
    %21 = arith.mulf %19, %20 : vector<1x256xf32>
    %cst_16 = arith.constant 9.99999974E-6 : f32
    %22 = vector.broadcast %cst_16 : f32 to vector<1x256xf32>
    %23 = arith.addf %21, %22 : vector<1x256xf32>
    %24 = math.rsqrt %23 : vector<1x256xf32>
    %25 = arith.mulf %3, %24 : vector<1x256xf32>
    %26 = vector.broadcast %25 : vector<1x256xf32> to vector<8x256xf32>
    %27 = arith.mulf %17, %26 : vector<8x256xf32>
    %28 = vector.broadcast %4 : vector<1x256xf32> to vector<8x256xf32>
    %29 = arith.addf %27, %28 : vector<8x256xf32>
    %c0_17 = arith.constant 0 : index
    %c0_18 = arith.constant 0 : index
    %30 = vector.load %arg2[%c0_17, %c0_18] : memref<256x256xf32, #tpu.memory_space<vmem>>, vector<256x256xf32>
    %cst_19 = arith.constant dense<0.000000e+00> : vector<8x256xf32>
    %31 = tpu.matmul %29, %30, %cst_19 {dimension_numbers = #tpu.dot_dimension_numbers<[1], [0], [0], [1], [0, 0, 1, 1], [], []>} : vector<8x256xf32>, vector<256x256xf32>, vector<8x256xf32> -> vector<8x256xf32>
    %32 = vector.broadcast %5 : vector<1x256xf32> to vector<8x256xf32>
    %33 = arith.addf %31, %32 : vector<8x256xf32>
    %cst_20 = arith.constant 0.000000e+00 : f32
    %34 = vector.broadcast %cst_20 : f32 to vector<8x256xf32>
    %35 = arith.maximumf %33, %34 : vector<8x256xf32>
    %cst_21 = arith.constant dense<0.000000e+00> : vector<1x256xf32>
    %36 = tpu.matmul %1, %35, %cst_21 {dimension_numbers = #tpu.dot_dimension_numbers<[1], [0], [0], [1], [0, 0, 1, 1], [], []>} : vector<1x8xf32>, vector<8x256xf32>, vector<1x256xf32> -> vector<1x256xf32>
    %cst_22 = arith.constant 1.250000e-01 : f32
    %37 = vector.broadcast %cst_22 : f32 to vector<1x256xf32>
    %38 = arith.mulf %36, %37 : vector<1x256xf32>
    %39 = vector.broadcast %38 : vector<1x256xf32> to vector<8x256xf32>
    %40 = arith.subf %35, %39 : vector<8x256xf32>
    %41 = arith.mulf %40, %40 : vector<8x256xf32>
    %cst_23 = arith.constant dense<0.000000e+00> : vector<1x256xf32>
    %42 = tpu.matmul %1, %41, %cst_23 {dimension_numbers = #tpu.dot_dimension_numbers<[1], [0], [0], [1], [0, 0, 1, 1], [], []>} : vector<1x8xf32>, vector<8x256xf32>, vector<1x256xf32> -> vector<1x256xf32>
    %cst_24 = arith.constant 1.250000e-01 : f32
    %43 = vector.broadcast %cst_24 : f32 to vector<1x256xf32>
    %44 = arith.mulf %42, %43 : vector<1x256xf32>
    %cst_25 = arith.constant 9.99999974E-6 : f32
    %45 = vector.broadcast %cst_25 : f32 to vector<1x256xf32>
    %46 = arith.addf %44, %45 : vector<1x256xf32>
    %47 = math.rsqrt %46 : vector<1x256xf32>
    %48 = arith.mulf %6, %47 : vector<1x256xf32>
    %49 = vector.broadcast %48 : vector<1x256xf32> to vector<8x256xf32>
    %50 = arith.mulf %40, %49 : vector<8x256xf32>
    %51 = vector.broadcast %7 : vector<1x256xf32> to vector<8x256xf32>
    %52 = arith.addf %50, %51 : vector<8x256xf32>
    %c0_26 = arith.constant 0 : index
    %c0_27 = arith.constant 0 : index
    %53 = vector.load %arg3[%c0_26, %c0_27] : memref<256x128xf32, #tpu.memory_space<vmem>>, vector<256x128xf32>
    %cst_28 = arith.constant dense<0.000000e+00> : vector<8x128xf32>
    %54 = tpu.matmul %52, %53, %cst_28 {dimension_numbers = #tpu.dot_dimension_numbers<[1], [0], [0], [1], [0, 0, 1, 1], [], []>} : vector<8x256xf32>, vector<256x128xf32>, vector<8x128xf32> -> vector<8x128xf32>
    %55 = vector.broadcast %8 : vector<1x128xf32> to vector<8x128xf32>
    %56 = arith.addf %54, %55 : vector<8x128xf32>
    %c0_29 = arith.constant 0 : index
    %c0_30 = arith.constant 0 : index
    %57 = vector.load %arg5[%c0_29, %c0_30] : memref<8x128xf32, #tpu.memory_space<vmem>>, vector<8x128xf32>
    tpu.vector_store %arg5[%c0_29, %c0_30], %56 {strides = array<i32>} : memref<8x128xf32, #tpu.memory_space<vmem>>, vector<8x128xf32>,
    return
  }
}

</mosaic_0001>

<bundles_post_ra>
// kernel: tpu_custom_call.1
= control target key start
LH: loop header
LB: loop body
LE: loop exit
PB: predicated region body
PF: predicated region fallthrough
CT: control target
= control target key end

     0   :  { %10 = vsyncpa [#allocation3], 0  ;;  %s1206_s0 = inlined_call_operand.hbm [shape: f32[8,32], index: 0, kind: input, shape index: {}]   ;;  %s1207_s1 = inlined_call_operand.hbm [shape: f32[32,256], index: 1, kind: input, shape index: {}]   ;;  %s1208_s2 = inlined_call_operand.hbm [shape: f32[256,256], index: 2, kind: input, shape index: {}]   ;;  %s1209_s3 = inlined_call_operand.hbm [shape: f32[256,128], index: 3, kind: input, shape index: {}]   ;;  %s1210_s4 = inlined_call_operand.hbm [shape: f32[8,256], index: 4, kind: input, shape index: {}]   ;;  %s1211_s5 = inlined_call_operand.hbm [shape: f32[8,128], index: 5, kind: output, shape index: {}]  }
   0x1   :  { %11 = vsyncpa [#allocation6], 0 }
   0x2   :  { %12 = vsyncpa [#allocation9], 0 }
   0x3   :  { %13 = vsyncpa [#allocation4], 0  ;;  %s1067_s18 = smov [#allocation5]  }
   0x4   :  { %s29_s19 = sshll.u32 %s1067_s18, 4  ;;  %s30_s19 = int_to_ptr.vmem [resolvable:$true] %s29_s19 }
   0x5   :  { %s947_s20 = scalar_lea.vmem %s30_s19, 1024  ;;  %p952_p1 = scmp.lt.s32.totalorder %s30_s19, %s30_s19 }
   0x6   :  { %p948_p0 = scmp.ne.s32.totalorder %s30_s19, %s947_s20  ;;  %p953_p2 = scmp.lt.s32.totalorder %s947_s20, %s947_s20 }
   0x8   :  { %p954_p3 = por %p953_p2, %p952_p1 }
   0xa   :  { %p955_p4 = pnand %p954_p3, %p948_p0 }
   0xc   :  { %958 = shalt.err (!%p955_p4)
}
   0xd   :  { %s1068_s21 = smov 256   ;;  %s1069_s22 = smov 16  }
   0xe   :  { %35 = dma.hbm_to_vmem [thread:$0]  %s1207_s1, 1024, %s30_s19, [#allocation6], %s1068_s21, %s1068_s21, %s1069_s22  }
   0xf   :  { %s1070_s25 = smov [#allocation8]  }
  0x10   :  { %s53_s26 = sshll.u32 %s1070_s25, 4  ;;  %s54_s26 = int_to_ptr.vmem [resolvable:$true] %s53_s26 }
  0x11   :  { %s967_s27 = scalar_lea.vmem %s54_s26, 4096  ;;  %p972_p6 = scmp.lt.s32.totalorder %s54_s26, %s54_s26 }
  0x12   :  { %p968_p5 = scmp.ne.s32.totalorder %s54_s26, %s967_s27  ;;  %p973_p7 = scmp.lt.s32.totalorder %s967_s27, %s967_s27 }
  0x14   :  { %p974_p8 = por %p973_p7, %p972_p6 }
  0x16   :  { %p975_p9 = pnand %p974_p8, %p968_p5 }
  0x18   :  { %978 = shalt.err (!%p975_p9)
}
  0x19   :  { %s1071_s28 = smov 128   ;;  %s1072_s29 = smov 8  }
  0x1a   :  { %59 = dma.hbm_to_vmem [thread:$0]  %s1209_s3, 4096, %s54_s26, [#allocation9], %s1071_s28, %s1071_s28, %s1072_s29  }
  0x1b   :  { %s1073_s7 = smov [#allocation2]   ;;  %s1074_s9 = smov [#allocation7]  }
  0x1c   :  { %s20_s8 = sshll.u32 %s1073_s7, 4  ;;  %s41_s1 = sshll.u32 %s1074_s9, 4  ;;  %s21_s8 = int_to_ptr.vmem [resolvable:$true] %s20_s8  ;;  %s42_s1 = int_to_ptr.vmem [resolvable:$true] %s41_s1 }
  0x1d   :  { %s987_s10 = scalar_lea.vmem %s21_s8, 128  ;;  %p992_p11 = scmp.lt.s32.totalorder %s21_s8, %s21_s8 }
  0x1e   :  { %p988_p10 = scmp.ne.s32.totalorder %s21_s8, %s987_s10  ;;  %p993_p12 = scmp.lt.s32.totalorder %s987_s10, %s987_s10 }
  0x20   :  { %p994_p13 = por %p993_p12, %p992_p11 }
  0x22   :  { %p995_p0 = pnand %p994_p13, %p988_p10 }
  0x24   :  { %998 = shalt.err (!%p995_p0)
}
  0x25   :  { %23 = dma.hbm_to_vmem [thread:$0]  %s1206_s0, 128, %s21_s8, [#allocation3]  }
  0x26   :  { %s1007_s13 = scalar_lea.vmem %s42_s1, 8192  ;;  %p1012_p2 = scmp.lt.s32.totalorder %s42_s1, %s42_s1 }
  0x27   :  { %p1008_p1 = scmp.ne.s32.totalorder %s42_s1, %s1007_s13  ;;  %p1013_p3 = scmp.lt.s32.totalorder %s1007_s13, %s1007_s13 }
  0x29   :  { %p1014_p4 = por %p1013_p3, %p1012_p2 }
  0x2b   :  { %p1015_p5 = pnand %p1014_p4, %p1008_p1 }
  0x2d   :  { %1018 = shalt.err (!%p1015_p5)
}
  0x2e   :  { %47 = dma.hbm_to_vmem [thread:$0]  %s1208_s2, 8192, %s42_s1, [#allocation6], %s1068_s21, %s1068_s21, %s1069_s22  }
  0x2f   :  { %s1075_s15 = smov [#allocation10]  }
  0x30   :  { %s66_s16 = sshll.u32 %s1075_s15, 4  ;;  %s67_s16 = int_to_ptr.vmem [resolvable:$true] %s66_s16 }
  0x31   :  { %s1027_s17 = scalar_lea.vmem %s67_s16, 256  ;;  %p1032_p7 = scmp.lt.s32.totalorder %s67_s16, %s67_s16 }
  0x32   :  { %p1028_p6 = scmp.ne.s32.totalorder %s67_s16, %s1027_s17  ;;  %p1033_p8 = scmp.lt.s32.totalorder %s1027_s17, %s1027_s17 }
  0x34   :  { %p1034_p9 = por %p1033_p8, %p1032_p7 }
  0x36   :  { %p1035_p10 = pnand %p1034_p9, %p1028_p6 }
  0x38   :  { %1038 = shalt.err (!%p1035_p10)
}
  0x39   :  { %69 = dma.hbm_to_vmem [thread:$0]  %s1210_s4, 256, %s67_s16, [#allocation9]  }
  0x3a   :  { %1059 = dma.done.wait [#allocation3], 128  }
  0x3b   :  { %1060 = vsyncadd [#allocation3], 4294967168 }
  0x3c   :  { %1061 = dma.done.wait [#allocation6], 9216  }
  0x3d   :  { %1062 = vsyncadd [#allocation6], 4294958080 }
  0x3e   :  { %1063 = dma.done.wait [#allocation9], 4352  }
  0x3f   :  { %1064 = vsyncadd [#allocation9], 4294962944  ;;  %v1076_v0 = vmov 0.0   ;;  %v105_v1 = vld [vmem:[#allocation5 + $0x38] sm:$0xff]  ;;  %v104_v2 = vld [vmem:[#allocation5 + $0x30] sm:$0xff]  ;;  %vm117_vm0 = vcmask 261120   ;;  %v107_v10 = vlaneseq }
  0x40   :  { %185 = vmatprep.mubr.f32.mxu0 %v1076_v0  ;;  %v103_v3 = vld [vmem:[#allocation5 + $0x28] sm:$0xff]  ;;  %145 = vmatprep.subr.mxu0 %v105_v1  ;;  %v102_v4 = vld [vmem:[#allocation5 + $0x20] sm:$0xff]  ;;  %v101_v5 = vld [vmem:[#allocation5 + $0x18] sm:$0xff]  ;;  %vm192_vm1 = vcmask 64512   ;;  %v1077_v21 = vmov 1.0   ;;  %s1079_s2 = smov [#allocation11]  }
  0x41   :  { %146 = vmatpush1.msra.mxu0 %v104_v2  ;;  %v100_v6 = vld [vmem:[#allocation5 + $0x10] sm:$0xff]  ;;  %v99_v7 = vld [vmem:[#allocation5 + $0x8] sm:$0xff]  ;;  %v98_v8 = vld [vmem:[#allocation5] sm:$0xff]  ;;  %v1133_v11 = vshrl.u32 %v107_v10, 7  ;;  %s867_s4 = sshll.u32 %s1079_s2, 4  ;;  %s868_s4 = int_to_ptr.vmem [resolvable:$true] %s867_s4 }
  0x42   :  { %147 = vmatprep.subr.mxu0 %v103_v3  ;;  %v85_v9 = vld [vmem:[#allocation2] sm:$0xff]  ;;  %v86_v14 = vld [vmem:[#allocation10] ss:$8 sm:$0x3]  ;;  %v433_v23 = vld [vmem:[#allocation7 + $0xf0] sm:$0xff]  ;;  %s1039_s19 = scalar_lea.vmem %s868_s4, 128  ;;  %p1044_p12 = scmp.lt.s32.totalorder %s868_s4, %s868_s4 }
  0x43   :  { %148 = vmatpush1.msra.mxu0 %v102_v4  ;;  %v1136_v12 = vsub.s32 1, %v1133_v11  ;;  %v1139_v13 = vsub.s32 0, %v1133_v11  ;;  %v434_v22 = vld [vmem:[#allocation7 + $0xf8] sm:$0xff]  ;;  %v432_v24 = vld [vmem:[#allocation7 + $0xe8] sm:$0xff]  ;;  %v431_v25 = vld [vmem:[#allocation7 + $0xe0] sm:$0xff]  ;;  %p1040_p11 = scmp.ne.s32.totalorder %s868_s4, %s1039_s19  ;;  %p1045_p13 = scmp.lt.s32.totalorder %s1039_s19, %s1039_s19 }
  0x44   :  { %149 = vmatprep.subr.mxu0 %v101_v5  ;;  %478 = vmatprep.subr.mxu1 %v434_v22  ;;  %v430_v26 = vld [vmem:[#allocation7 + $0xd8] sm:$0xff]  ;;  %v429_v27 = vld [vmem:[#allocation7 + $0xd0] sm:$0xff]  ;;  %v428_v28 = vld [vmem:[#allocation7 + $0xc8] sm:$0xff] }
  0x45   :  { %150 = vmatpush1.msra.mxu0 %v100_v6  ;;  %v114_v15 = vrot.slane %v86_v14, %v1136_v12  ;;  %v110_v16 = vrot.slane %v86_v14, %v1139_v13  ;;  %479 = vmatpush1.msra.mxu1 %v433_v23  ;;  %v427_v29 = vld [vmem:[#allocation7 + $0xc0] sm:$0xff]  ;;  %v426_v30 = vld [vmem:[#allocation7 + $0xb8] sm:$0xff]  ;;  %v425_v31 = vld [vmem:[#allocation7 + $0xb0] sm:$0xff]  ;;  %p1046_p0 = por %p1045_p13, %p1044_p12 }
  0x46   :  { %151 = vmatprep.subr.mxu0 %v99_v7  ;;  %480 = vmatprep.subr.mxu1 %v432_v24  ;;  %v424_v32 = vld [vmem:[#allocation7 + $0xa8] sm:$0xff]  ;;  %v423_v33 = vld [vmem:[#allocation7 + $0xa0] sm:$0xff]  ;;  %v422_v34 = vld [vmem:[#allocation7 + $0x98] sm:$0xff] }
  0x47   :  { %152 = vmatpush1.msra.mxu0 %v98_v8  ;;  %481 = vmatpush1.msra.mxu1 %v431_v25  ;;  %v421_v35 = vld [vmem:[#allocation7 + $0x90] sm:$0xff]  ;;  %v420_v36 = vld [vmem:[#allocation7 + $0x88] sm:$0xff]  ;;  %v419_v37 = vld [vmem:[#allocation7 + $0x80] sm:$0xff]  ;;  %p1047_p1 = pnand %p1046_p0, %p1040_p11 }
  0x48   :  { %878 = vmatmul.mubr.msk.f32.vlgmr.msra.gmra.mxu0 %vm117_vm0, %v85_v9  ;;  %482 = vmatprep.subr.mxu1 %v430_v26  ;;  %v418_v38 = vld [vmem:[#allocation7 + $0x78] sm:$0xff]  ;;  %v417_v39 = vld [vmem:[#allocation7 + $0x70] sm:$0xff]  ;;  %v416_v40 = vld [vmem:[#allocation7 + $0x68] sm:$0xff] }
  0x49   :  { %260 = vmatprep.mubr.f32.mxu0 %v1076_v0  ;;  %483 = vmatpush1.msra.mxu1 %v429_v27  ;;  %v415_v41 = vld [vmem:[#allocation7 + $0x60] sm:$0xff]  ;;  %v414_v42 = vld [vmem:[#allocation7 + $0x58] sm:$0xff]  ;;  %v413_v43 = vld [vmem:[#allocation7 + $0x50] sm:$0xff] }
  0x4a   :  { %484 = vmatprep.subr.mxu1 %v428_v28  ;;  %v412_v44 = vld [vmem:[#allocation7 + $0x48] sm:$0xff]  ;;  %v411_v45 = vld [vmem:[#allocation7 + $0x40] sm:$0xff]  ;;  %v410_v46 = vld [vmem:[#allocation7 + $0x38] sm:$0xff] }
  0x4b   :  { %485 = vmatpush1.msra.mxu1 %v427_v29  ;;  %v409_v47 = vld [vmem:[#allocation7 + $0x30] sm:$0xff]  ;;  %v408_v48 = vld [vmem:[#allocation7 + $0x28] sm:$0xff]  ;;  %v407_v49 = vld [vmem:[#allocation7 + $0x20] sm:$0xff] }
  0x4c   :  { %486 = vmatprep.subr.mxu1 %v426_v30  ;;  %v406_v60 = vld [vmem:[#allocation7 + $0x18] sm:$0xff]  ;;  %v405_v61 = vld [vmem:[#allocation7 + $0x10] sm:$0xff]  ;;  %v404_v62 = vld [vmem:[#allocation7 + $0x8] sm:$0xff] }
  0x4d   :  { %487 = vmatpush1.msra.mxu1 %v425_v31  ;;  %v403_v63 = vld [vmem:[#allocation7] sm:$0xff]  ;;  %v466_v1 = vld [vmem:[#allocation7 + $0x1f8] sm:$0xff]  ;;  %v465_v2 = vld [vmem:[#allocation7 + $0x1f0] sm:$0xff] }
  0x4e   :  { %488 = vmatprep.subr.mxu1 %v424_v32  ;;  %v464_v3 = vld [vmem:[#allocation7 + $0x1e8] sm:$0xff]  ;;  %v463_v4 = vld [vmem:[#allocation7 + $0x1e0] sm:$0xff]  ;;  %v462_v5 = vld [vmem:[#allocation7 + $0x1d8] sm:$0xff] }
  0x4f   :  { %489 = vmatpush1.msra.mxu1 %v423_v33  ;;  %v461_v6 = vld [vmem:[#allocation7 + $0x1d0] sm:$0xff]  ;;  %v460_v7 = vld [vmem:[#allocation7 + $0x1c8] sm:$0xff]  ;;  %v459_v8 = vld [vmem:[#allocation7 + $0x1c0] sm:$0xff] }
  0x50   :  { %490 = vmatprep.subr.mxu1 %v422_v34  ;;  %v458_v9 = vld [vmem:[#allocation7 + $0x1b8] sm:$0xff]  ;;  %v457_v10 = vld [vmem:[#allocation7 + $0x1b0] sm:$0xff]  ;;  %v456_v14 = vld [vmem:[#allocation7 + $0x1a8] sm:$0xff] }
  0x51   :  { %491 = vmatpush1.msra.mxu1 %v421_v35  ;;  %v449_v22 = vld [vmem:[#allocation7 + $0x170] sm:$0xff]  ;;  %v448_v23 = vld [vmem:[#allocation7 + $0x168] sm:$0xff]  ;;  %v447_v24 = vld [vmem:[#allocation7 + $0x160] sm:$0xff] }
  0x52   :  { %492 = vmatprep.subr.mxu1 %v420_v36  ;;  %v446_v25 = vld [vmem:[#allocation7 + $0x158] sm:$0xff]  ;;  %v445_v26 = vld [vmem:[#allocation7 + $0x150] sm:$0xff]  ;;  %v444_v27 = vld [vmem:[#allocation7 + $0x148] sm:$0xff] }
  0x53   :  { %493 = vmatpush1.msra.mxu1 %v419_v37  ;;  %v443_v28 = vld [vmem:[#allocation7 + $0x140] sm:$0xff]  ;;  %v442_v29 = vld [vmem:[#allocation7 + $0x138] sm:$0xff]  ;;  %v441_v30 = vld [vmem:[#allocation7 + $0x130] sm:$0xff] }
  0x54   :  { %494 = vmatprep.subr.mxu1 %v418_v38  ;;  %v440_v31 = vld [vmem:[#allocation7 + $0x128] sm:$0xff]  ;;  %v439_v32 = vld [vmem:[#allocation7 + $0x120] sm:$0xff]  ;;  %v438_v33 = vld [vmem:[#allocation7 + $0x118] sm:$0xff] }
  0x55   :  { %495 = vmatpush1.msra.mxu1 %v417_v39  ;;  %v437_v34 = vld [vmem:[#allocation7 + $0x110] sm:$0xff]  ;;  %v436_v35 = vld [vmem:[#allocation7 + $0x108] sm:$0xff]  ;;  %v435_v36 = vld [vmem:[#allocation7 + $0x100] sm:$0xff] }
  0x56   :  { %496 = vmatprep.subr.mxu1 %v416_v40 }
  0x57   :  { %497 = vmatpush1.msra.mxu1 %v415_v41 }
  0x58   :  { %498 = vmatprep.subr.mxu1 %v414_v42 }
  0x59   :  { %499 = vmatpush1.msra.mxu1 %v413_v43  ;;  %v1078_v43 = vmov 1966171168  }
  0x5a   :  { %500 = vmatprep.subr.mxu1 %v412_v44  ;;  %v362_v44 = vunpack.c.l.s4 %v1078_v43  ;;  %v762_v43 = vld [vmem:[#allocation8 + $0x20] sm:$0xff] }
  0x5b   :  { %501 = vmatpush1.msra.mxu1 %v411_v45 }
  0x5c   :  { %502 = vmatprep.subr.mxu1 %v410_v46  ;;  %v363_v45 = vunpack.c.0.s8 %v362_v44  ;;  %v777_v44 = vld [vmem:[#allocation8 + $0x98] sm:$0xff] }
  0x5d   :  { %503 = vmatpush1.msra.mxu1 %v409_v47 }
  0x5e   :  { %504 = vmatprep.subr.mxu1 %v408_v48  ;;  %v1168_v47 = vsub.s32 %v363_v45, %v1133_v11  ;;  %v761_v45 = vld [vmem:[#allocation8 + $0x18] sm:$0xff] }
  0x5f   :  { %505 = vmatpush1.msra.mxu1 %v407_v49 }
  0x60   :  { %506 = vmatprep.subr.mxu1 %v406_v60 }
  0x61   :  { %507 = vmatpush1.msra.mxu1 %v405_v61 }
  0x62   :  { %508 = vmatprep.subr.mxu1 %v404_v62 }
  0x63   :  { %509 = vmatpush1.msra.mxu1 %v403_v63 }
  0x64   :  { %510 = vmatprep.subr.mxu1 %v466_v1  ;;  %v92_v1 = vld [vmem:[#allocation10 + $0x3] ss:$8 sm:$0x3] }
  0x65   :  { %511 = vmatpush2.msra.mxu1 %v465_v2  ;;  %v471_v2 = vrot.slane %v92_v1, %v1139_v13 }
  0x66   :  { %512 = vmatprep.subr.mxu1 %v464_v3  ;;  %v475_v3 = vrot.slane %v92_v1, %v1136_v12  ;;  %v94_v1 = vld [vmem:[#allocation10 + $0x4] ss:$8 sm:$0x3] }
  0x67   :  { %513 = vmatpush2.msra.mxu1 %v463_v4 }
  0x68   :  { %514 = vmatprep.subr.mxu1 %v462_v5 }
  0x69   :  { %515 = vmatpush2.msra.mxu1 %v461_v6 }
  0x6a   :  { %516 = vmatprep.subr.mxu1 %v460_v7 }
  0x6b   :  { %517 = vmatpush2.msra.mxu1 %v459_v8 }
  0x6c   :  { %518 = vmatprep.subr.mxu1 %v458_v9 }
  0x6d   :  { %519 = vmatpush2.msra.mxu1 %v457_v10 }
  0x6e   :  { %520 = vmatprep.subr.mxu1 %v456_v14 }
 0x108   :  { %v187_v17 = vpop.f32.mrf.mxu0 }
 0x109   :  { %v1145_v20 = vadd.f32 %v187_v17, %v110_v16  ;;  %v454_v16 = vld [vmem:[#allocation7 + $0x198] sm:$0xff]  ;;  %v453_v17 = vld [vmem:[#allocation7 + $0x190] sm:$0xff] }
 0x10a   :  { %v189_v18 = vpop.f32.mrf.mxu0 }
 0x10b   :  { %v1143_v19 = vadd.f32 %v189_v18, %v114_v15  ;;  %v455_v15 = vld [vmem:[#allocation7 + $0x1a0] sm:$0xff]  ;;  %v452_v18 = vld [vmem:[#allocation7 + $0x188] sm:$0xff] }
 0x10c   :  { %521 = vmatpush2.msra.mxu1 %v455_v15 }
 0x10d   :  { %226 = vmatprep.subr.mxu0 %v1143_v19  ;;  %522 = vmatprep.subr.mxu1 %v454_v16 }
 0x10e   :  { %227 = vmatpush1.msra.mxu0 %v1145_v20  ;;  %523 = vmatpush2.msra.mxu1 %v453_v17 }
 0x10f   :  { %879 = vmatmul.mubr.msk.f32.vlgmr.msra.gmra.mxu0 %vm192_vm1, %v1077_v21  ;;  %524 = vmatprep.subr.mxu1 %v452_v18 }
 0x110   :  { %345 = vmatprep.mubr.f32.mxu0 %v1076_v0 }
 0x1cf   :  { %v262_v50 = vpop.f32.mrf.mxu0 }
 0x1d0   :  { %v267_v51 = vmul.f32 0.125, %v262_v50 }
 0x1d1   :  { %v264_v52 = vpop.f32.mrf.mxu0 }
 0x1d2   :  { %v272_v53 = vrot.slane %v267_v51, %v1139_v13  ;;  %v268_v54 = vmul.f32 0.125, %v264_v52  ;;  %v88_v51 = vld [vmem:[#allocation10 + $0x1] ss:$8 sm:$0x3] }
 0x1d4   :  { %v276_v55 = vrot.slane %v268_v54, %v1139_v13  ;;  %v1155_v56 = vsub.f32 %v1145_v20, %v272_v53  ;;  %v450_v20 = vld [vmem:[#allocation7 + $0x178] sm:$0xff]  ;;  %v90_v53 = vld [vmem:[#allocation10 + $0x2] ss:$8 sm:$0x3] }
 0x1d6   :  { %v1158_v57 = vsub.f32 %v1143_v19, %v276_v55  ;;  %v279_v59 = vmul.f32 %v1155_v56, %v1155_v56  ;;  %v451_v19 = vld [vmem:[#allocation7 + $0x180] sm:$0xff] }
 0x1d7   :  { %525 = vmatpush2.msra.mxu1 %v451_v19 }
 0x1d8   :  { %v280_v58 = vmul.f32 %v1158_v57, %v1158_v57  ;;  %526 = vmatprep.subr.mxu1 %v450_v20 }
 0x1d9   :  { %527 = vmatpush2.msra.mxu1 %v449_v22  ;;  %v773_v22 = vld [vmem:[#allocation8 + $0x78] sm:$0xff] }
 0x1da   :  { %311 = vmatprep.subr.mxu0 %v280_v58  ;;  %528 = vmatprep.subr.mxu1 %v448_v23  ;;  %v394_v58 = vrot.slane %v90_v53, %v1139_v13  ;;  %v788_v23 = vld [vmem:[#allocation8 + $0xf0] sm:$0xff] }
 0x1db   :  { %312 = vmatpush1.msra.mxu0 %v279_v59  ;;  %529 = vmatpush2.msra.mxu1 %v447_v24  ;;  %v398_v59 = vrot.slane %v90_v53, %v1136_v12  ;;  %v772_v24 = vld [vmem:[#allocation8 + $0x70] sm:$0xff] }
 0x1dc   :  { %880 = vmatmul.mubr.msk.f32.vlgmr.msra.gmra.mxu0 %vm192_vm1, %v1077_v21  ;;  %530 = vmatprep.subr.mxu1 %v446_v25  ;;  %v787_v25 = vld [vmem:[#allocation8 + $0xe8] sm:$0xff] }
 0x1dd   :  { %615 = vmatprep.mubr.f32.mxu0 %v1076_v0  ;;  %531 = vmatpush2.msra.mxu1 %v445_v26  ;;  %v771_v26 = vld [vmem:[#allocation8 + $0x68] sm:$0xff] }
 0x1de   :  { %532 = vmatprep.subr.mxu1 %v444_v27  ;;  %v786_v27 = vld [vmem:[#allocation8 + $0xe0] sm:$0xff] }
 0x1df   :  { %533 = vmatpush2.msra.mxu1 %v443_v28  ;;  %v770_v28 = vld [vmem:[#allocation8 + $0x60] sm:$0xff] }
 0x1e0   :  { %534 = vmatprep.subr.mxu1 %v442_v29  ;;  %v785_v29 = vld [vmem:[#allocation8 + $0xd8] sm:$0xff] }
 0x1e1   :  { %535 = vmatpush2.msra.mxu1 %v441_v30  ;;  %v769_v30 = vld [vmem:[#allocation8 + $0x58] sm:$0xff] }
 0x1e2   :  { %536 = vmatprep.subr.mxu1 %v440_v31  ;;  %v768_v31 = vld [vmem:[#allocation8 + $0x50] sm:$0xff] }
 0x1e3   :  { %537 = vmatpush2.msra.mxu1 %v439_v32  ;;  %v783_v32 = vld [vmem:[#allocation8 + $0xc8] sm:$0xff] }
 0x1e4   :  { %538 = vmatprep.subr.mxu1 %v438_v33  ;;  %v767_v33 = vld [vmem:[#allocation8 + $0x48] sm:$0xff] }
 0x1e5   :  { %539 = vmatpush2.msra.mxu1 %v437_v34  ;;  %v782_v34 = vld [vmem:[#allocation8 + $0xc0] sm:$0xff] }
 0x1e6   :  { %540 = vmatprep.subr.mxu1 %v436_v35  ;;  %v766_v35 = vld [vmem:[#allocation8 + $0x40] sm:$0xff] }
 0x1e7   :  { %541 = vmatpush2.msra.mxu1 %v435_v36  ;;  %v781_v36 = vld [vmem:[#allocation8 + $0xb8] sm:$0xff] }
 0x29c   :  { %v347_v37 = vpop.f32.mrf.mxu0 }
 0x29d   :  { %v352_v38 = vmul.f32 0.125, %v347_v37  ;;  %v765_v37 = vld [vmem:[#allocation8 + $0x38] sm:$0xff] }
 0x29e   :  { %v349_v39 = vpop.f32.mrf.mxu0 }
 0x29f   :  { %v354_v40 = vadd.f32 1e-05, %v352_v38  ;;  %v353_v41 = vmul.f32 0.125, %v349_v39  ;;  %v780_v38 = vld [vmem:[#allocation8 + $0xb0] sm:$0xff] }
 0x2a0   :  { %v764_v39 = vld [vmem:[#allocation8 + $0x30] sm:$0xff] }
 0x2a1   :  { %v355_v42 = vadd.f32 1e-05, %v353_v41  ;;  %931 = vrsqrt.f32 %v354_v40  ;;  %v779_v40 = vld [vmem:[#allocation8 + $0xa8] sm:$0xff] }
 0x2a2   :  { %v763_v41 = vld [vmem:[#allocation8 + $0x28] sm:$0xff] }
 0x2a3   :  { %933 = vrsqrt.f32 %v355_v42  ;;  %v778_v42 = vld [vmem:[#allocation8 + $0xa0] sm:$0xff] }
 0x2ae   :  { %v932_v46 = vpop.eup %931 }
 0x2b0   :  { %v934_v48 = vpop.eup %933 }
 0x2b1   :  { %v360_v49 = vcombine.low %v932_v46, %v934_v48  ;;  %v776_v46 = vld [vmem:[#allocation8 + $0x90] sm:$0xff] }
 0x2b2   :  { %v760_v48 = vld [vmem:[#allocation8 + $0x10] sm:$0xff] }
 0x2b3   :  { %v367_v50 = vrot.slane %v360_v49, %v1168_v47  ;;  %v775_v49 = vld [vmem:[#allocation8 + $0x88] sm:$0xff] }
 0x2b5   :  { %v374_v52 = vrot.slane %v367_v50, %v1168_v47  ;;  %v759_v50 = vld [vmem:[#allocation8 + $0x8] sm:$0xff] }
 0x2b7   :  { %v376_v54 = vmul.f32 %v374_v52, %v88_v51  ;;  %v774_v51 = vld [vmem:[#allocation8 + $0x80] sm:$0xff] }
 0x2b8   :  { %v758_v52 = vld [vmem:[#allocation8] sm:$0xff] }
 0x2b9   :  { %v385_v55 = vrot.slane %v376_v54, %v1136_v12  ;;  %v381_v60 = vrot.slane %v376_v54, %v1139_v13 }
 0x2bb   :  { %v389_v11 = vmul.f32 %v385_v55, %v1158_v57  ;;  %v388_v61 = vmul.f32 %v381_v60, %v1155_v56 }
 0x2bd   :  { %v402_v62 = vadd.f32 %v398_v59, %v389_v11  ;;  %v401_v63 = vadd.f32 %v394_v58, %v388_v61 }
 0x2bf   :  { %542 = vmatprep.mubr.f32.mxu1 %v402_v62 }
 0x2c0   :  { %543 = vmatmul.mubr.f32.vlgmr.msra.gmra.mxu1 %v401_v63 }
 0x380   :  { %v544_v4 = vpop.f32.mrf.mxu1 }
 0x381   :  { %v545_v5 = vadd.f32 %v544_v4, %v471_v2 }
 0x382   :  { %v546_v6 = vpop.f32.mrf.mxu1 }
 0x383   :  { %v547_v7 = vadd.f32 %v546_v6, %v475_v3  ;;  %v549_v9 = vmax.f32 %v545_v5, 0.0  ;;  %v96_v3 = vld [vmem:[#allocation10 + $0x5] ss:$8 sm:$0x3] }
 0x384   :  { %v749_v6 = vrot.slane %v96_v3, %v1139_v13 }
 0x385   :  { %v550_v8 = vmax.f32 %v547_v7, 0.0  ;;  %v753_v7 = vrot.slane %v96_v3, %v1136_v12 }
 0x387   :  { %581 = vmatprep.subr.mxu0 %v550_v8 }
 0x388   :  { %582 = vmatpush1.msra.mxu0 %v549_v9 }
 0x389   :  { %881 = vmatmul.mubr.msk.f32.vlgmr.msra.gmra.mxu0 %vm192_vm1, %v1077_v21 }
 0x38a   :  { %700 = vmatprep.mubr.f32.mxu0 %v1076_v0  ;;  %v789_v0 = vld [vmem:[#allocation8 + $0xf8] sm:$0xff] }
 0x449   :  { %v617_v56 = vpop.f32.mrf.mxu0 }
 0x44a   :  { %v622_v57 = vmul.f32 0.125, %v617_v56 }
 0x44b   :  { %v619_v10 = vpop.f32.mrf.mxu0 }
 0x44c   :  { %v627_v14 = vrot.slane %v622_v57, %v1139_v13  ;;  %v623_v15 = vmul.f32 0.125, %v619_v10 }
 0x44e   :  { %v631_v16 = vrot.slane %v623_v15, %v1139_v13  ;;  %v1185_v17 = vsub.f32 %v549_v9, %v627_v14 }
 0x450   :  { %v1187_v18 = vsub.f32 %v550_v8, %v631_v16  ;;  %v634_v20 = vmul.f32 %v1185_v17, %v1185_v17 }
 0x452   :  { %v635_v19 = vmul.f32 %v1187_v18, %v1187_v18 }
 0x454   :  { %666 = vmatprep.subr.mxu0 %v635_v19 }
 0x455   :  { %667 = vmatpush1.msra.mxu0 %v634_v20 }
 0x456   :  { %882 = vmatmul.mubr.msk.f32.vlgmr.msra.gmra.mxu0 %vm192_vm1, %v1077_v21  ;;  %883 = vmatprep.subr.mxu0 %v789_v0  ;;  %v784_v21 = vld [vmem:[#allocation8 + $0xd0] sm:$0xff] }
 0x457   :  { %884 = vmatpush3.msra.mxu0 %v773_v22 }
 0x458   :  { %885 = vmatprep.subr.mxu0 %v788_v23 }
 0x459   :  { %886 = vmatpush3.msra.mxu0 %v772_v24 }
 0x45a   :  { %887 = vmatprep.subr.mxu0 %v787_v25 }
 0x45b   :  { %888 = vmatpush3.msra.mxu0 %v771_v26 }
 0x45c   :  { %889 = vmatprep.subr.mxu0 %v786_v27 }
 0x45d   :  { %890 = vmatpush3.msra.mxu0 %v770_v28 }
 0x45e   :  { %891 = vmatprep.subr.mxu0 %v785_v29 }
 0x45f   :  { %892 = vmatpush3.msra.mxu0 %v769_v30 }
 0x460   :  { %893 = vmatprep.subr.mxu0 %v784_v21 }
 0x461   :  { %894 = vmatpush3.msra.mxu0 %v768_v31 }
 0x462   :  { %895 = vmatprep.subr.mxu0 %v783_v32 }
 0x463   :  { %896 = vmatpush3.msra.mxu0 %v767_v33 }
 0x464   :  { %897 = vmatprep.subr.mxu0 %v782_v34 }
 0x465   :  { %898 = vmatpush3.msra.mxu0 %v766_v35 }
 0x466   :  { %899 = vmatprep.subr.mxu0 %v781_v36 }
 0x467   :  { %900 = vmatpush3.msra.mxu0 %v765_v37 }
 0x468   :  { %901 = vmatprep.subr.mxu0 %v780_v38 }
 0x469   :  { %902 = vmatpush3.msra.mxu0 %v764_v39 }
 0x46a   :  { %903 = vmatprep.subr.mxu0 %v779_v40 }
 0x46b   :  { %904 = vmatpush3.msra.mxu0 %v763_v41 }
 0x46c   :  { %905 = vmatprep.subr.mxu0 %v778_v42 }
 0x46d   :  { %906 = vmatpush3.msra.mxu0 %v762_v43 }
 0x46e   :  { %907 = vmatprep.subr.mxu0 %v777_v44 }
 0x46f   :  { %908 = vmatpush3.msra.mxu0 %v761_v45 }
 0x470   :  { %909 = vmatprep.subr.mxu0 %v776_v46 }
 0x471   :  { %910 = vmatpush3.msra.mxu0 %v760_v48 }
 0x472   :  { %911 = vmatprep.subr.mxu0 %v775_v49 }
 0x473   :  { %912 = vmatpush3.msra.mxu0 %v759_v50 }
 0x474   :  { %913 = vmatprep.subr.mxu0 %v774_v51 }
 0x475   :  { %914 = vmatpush3.msra.mxu0 %v758_v52 }
 0x516   :  { %v702_v53 = vpop.f32.mrf.mxu0 }
 0x517   :  { %v707_v54 = vmul.f32 0.125, %v702_v53 }
 0x518   :  { %v704_v55 = vpop.f32.mrf.mxu0 }
 0x519   :  { %v709_v58 = vadd.f32 1e-05, %v707_v54  ;;  %v708_v59 = vmul.f32 0.125, %v704_v55 }
 0x51b   :  { %v710_v60 = vadd.f32 1e-05, %v708_v59  ;;  %935 = vrsqrt.f32 %v709_v58 }
 0x51d   :  { %937 = vrsqrt.f32 %v710_v60 }
 0x528   :  { %v936_v11 = vpop.eup %935 }
 0x52a   :  { %v938_v61 = vpop.eup %937 }
 0x52b   :  { %v715_v62 = vcombine.low %v936_v11, %v938_v61 }
 0x52d   :  { %v722_v63 = vrot.slane %v715_v62, %v1168_v47 }
 0x52f   :  { %v729_v2 = vrot.slane %v722_v63, %v1168_v47  ;;  %v97_v47 = vld [vmem:[#allocation10 + $0x6] ss:$0 sm:$0xff] }
 0x531   :  { %v731_v4 = vmul.f32 %v729_v2, %v94_v1 }
 0x533   :  { %v740_v5 = vrot.slane %v731_v4, %v1136_v12  ;;  %v736_v8 = vrot.slane %v731_v4, %v1139_v13 }
 0x535   :  { %v744_v9 = vmul.f32 %v740_v5, %v1187_v18  ;;  %v743_v56 = vmul.f32 %v736_v8, %v1185_v17 }
 0x537   :  { %v757_v57 = vadd.f32 %v753_v7, %v744_v9  ;;  %v756_v10 = vadd.f32 %v749_v6, %v743_v56 }
 0x539   :  { %854 = vmatprep.mubr.f32.mxu0 %v757_v57 }
 0x53a   :  { %855 = vmatmul.mubr.f32.vlgmr.msra.gmra.mxu0 %v756_v10 }
 0x5fa   :  { %v915_v14 = vpop.f32.mrf.mxu0 }
 0x5fc   :  { %v916_v15 = vpop.f32.mrf.mxu0 }
 0x5fd   :  { %v917_v16 = vadd.f32 %v916_v15, %v915_v14 }
 0x5ff   :  { %v857_v19 = vadd.f32 %v917_v16, %v97_v47 }
 0x601   :  { %860 = vst [vmem:[#allocation11] sm:$0xff] %v857_v19 }
 0x602   :  { %1050 = shalt.err (!%p1047_p1)
}
 0x603   :  { %870 = dma.vmem_to_hbm [thread:$0]  %s868_s4, 128, %s1211_s5, [#allocation4]  }
 0x604   :  { %1065 = dma.done.wait [#allocation4], 128  }
 0x605   :  { %1066 = vsyncadd [#allocation4], 4294967168 }
 0x606   :  { %874 = vsyncpa [#allocation3], 1 }
 0x607   :  { %875 = vsyncpa [#allocation6], 1 }
 0x608   :  { %876 = vsyncpa [#allocation9], 1 }
 0x609   :  { %877 = vsyncpa [#allocation4], 1 }

</bundles_post_ra>
